<compile_context>
chip_gen: v5e
topology: v5e:2x2
jax: 0.10.0
libtpu: 0.0.40
codegen_flags: <defaults>
</compile_context>

<pallas_src>
import numpy as np
import jax
import jax.numpy as jnp
from jax.experimental import pallas as pl
from jax.experimental.pallas import tpu as pltpu


KERNEL_SIZE = 3
SIGMA = 0.3 * ((KERNEL_SIZE - 1) * 0.5 - 1) + 0.8  # torchvision default -> 0.8


def _gaussian_kernel1d(ksize: int, sigma: float) -> np.ndarray:
    """1-D gaussian identical to torchvision's construction (sums to 1)."""
    half = (ksize - 1) * 0.5
    x = np.linspace(-half, half, ksize)
    pdf = np.exp(-0.5 * (x / sigma) ** 2)
    return (pdf / pdf.sum()).astype(np.float32)


K1D = _gaussian_kernel1d(KERNEL_SIZE, SIGMA)   # (3,)  separable taps
K2D = np.outer(K1D, K1D).astype(np.float32)    # (3,3) only for the numpy reference


def _round_up(x: int, m: int) -> int:
    return (x + m - 1) // m * m


def _make_blur_kernel(H: int, W: int, w_edge: float, w_center: float):
    """Separable reflect-boundary 3x3 gaussian on a (BC, H, W) block."""

    def blur_kernel(x_ref, o_ref):
        x = x_ref[...]
        if x.dtype != jnp.float32:
            x = x.astype(jnp.float32)

        shape = x.shape  # (BC, H, W); H = sublane axis, W = lane axis
        row = jax.lax.broadcasted_iota(jnp.int32, shape, 1)
        col = jax.lax.broadcasted_iota(jnp.int32, shape, 2)

        # ---- Vertical 3-tap pass (sublane rolls), reflect boundary ------
        up = pltpu.roll(x, shift=1, axis=1)        # up[i] = x[i-1] (wraps at 0)
        dn = pltpu.roll(x, shift=H - 1, axis=1)    # dn[i] = x[i+1] (wraps at H-1)
        up = jnp.where(row == 0, dn, up)           # reflect: x[-1] -> x[1]
        dn = jnp.where(row == H - 1, up, dn)       # reflect: x[H]  -> x[H-2]
        v = w_center * x + w_edge * (up + dn)

        # ---- Horizontal 3-tap pass (lane rolls), reflect boundary -------
        lt = pltpu.roll(v, shift=1, axis=2)        # lt[j] = v[j-1] (wraps at 0)
        rt = pltpu.roll(v, shift=W - 1, axis=2)    # rt[j] = v[j+1] (wraps at W-1)
        lt = jnp.where(col == 0, rt, lt)           # reflect: v[-1] -> v[1]
        rt = jnp.where(col == W - 1, lt, rt)       # reflect: v[W]  -> v[W-2]
        out = w_center * v + w_edge * (lt + rt)

        o_ref[...] = out.astype(o_ref.dtype)

    return blur_kernel


def gaussian_blur(image: jax.Array) -> jax.Array:
    """image: (N, C, H, W) float array -> gaussian_blur(image, kernel_size=3)."""
    N, C, H, W = image.shape
    assert H >= 2 and W >= 2, "reflect padding with pad=1 requires H, W >= 2"
    P = N * C
    x = image.reshape(P, H, W)
    # TODO(synk): if dominant image sizes have W < 128, pack several planes
    # side-by-side along the lane axis (with seam masking) for lane-dense
    # vregs/stores; for the tested shapes we accept the lane padding.

    itemsize = jnp.dtype(image.dtype).itemsize
    # Layout-accurate per-plane VMEM bytes: lanes round to 128, sublanes round
    # to the dtype's tile (8 for f32, 16 for bf16, 32 for 1-byte dtypes).
    sub_io = 8 * max(1, 4 // itemsize)
    lane_w = _round_up(W, 128)
    h_io = _round_up(H, sub_io)
    h_f32 = _round_up(H, 8)
    io_plane = h_io * lane_w * itemsize            # one plane, one direction
    f32_plane = h_f32 * lane_w * 4
    # Double-buffered input + output blocks plus a conservative 6 f32
    # temporaries (x_f32 / up / dn / v / lt / rt, with some compiler reuse).
    per_plane = 2 * io_plane + 2 * io_plane + 6 * f32_plane

    # Generation-aware VMEM budget: 128 MiB physical on v5e/v6e, 64 MiB on v7x.
    try:
        vmem_cap = int(pltpu.get_tpu_info().vmem_capacity_bytes)
    except Exception:
        vmem_cap = 64 * 1024 * 1024                # v7x-safe fallback
    vmem_limit = int(min(vmem_cap * 3 // 4, 112 * 1024 * 1024))
    budget = vmem_limit // 2                       # block bytes; rest = headroom

    bc = int(max(1, min(P, budget // per_plane)))  # planes per grid step
    # Keep >= ~8 grid steps so DMA/compute double-buffering has work to overlap
    # and the v7x megacore can shard the "parallel" axis across both cores.
    bc = int(min(bc, max(1, pl.cdiv(P, 8))))
    grid = (pl.cdiv(P, bc),)
    # TODO(synk): if a single plane alone exceeds the VMEM budget (very large
    # H*W), add row tiling with a 1-row halo instead of whole-plane blocks.

    w_edge = float(K1D[0])
    w_center = float(K1D[1])

    cost = pl.CostEstimate(
        flops=12 * P * H * W,                      # ~6 mul-adds / elem (separable)
        transcendentals=0,
        bytes_accessed=2 * P * H * W * itemsize,   # one read + one write of the image
    )

    out = pl.pallas_call(
        _make_blur_kernel(H, W, w_edge, w_center),
        out_shape=jax.ShapeDtypeStruct((P, H, W), image.dtype),
        grid=grid,
        in_specs=[pl.BlockSpec((bc, H, W), lambda i: (i, 0, 0))],
        out_specs=pl.BlockSpec((bc, H, W), lambda i: (i, 0, 0)),
        compiler_params=pltpu.CompilerParams(
            dimension_semantics=("parallel",),
            vmem_limit_bytes=vmem_limit,
        ),
        cost_estimate=cost,
    )(x)
    return out.reshape(N, C, H, W)


def _reference_blur(image: np.ndarray) -> np.ndarray:
    """Pure-numpy reference: 2-D 9-tap depthwise conv with reflect padding."""
    N, C, H, W = image.shape
    pad = KERNEL_SIZE // 2
    xp = np.pad(image.astype(np.float32),
                ((0, 0), (0, 0), (pad, pad), (pad, pad)), mode="reflect")
    out = np.zeros((N, C, H, W), dtype=np.float32)
    for dy in range(KERNEL_SIZE):
        for dx in range(KERNEL_SIZE):
            out += K2D[dy, dx] * xp[:, :, dy:dy + H, dx:dx + W]
    return out.astype(image.dtype)


if __name__ == "__main__":
    key = jax.random.PRNGKey(0)
    N, C, H, W = 2, 4, 16, 16
    image = jax.random.uniform(key, (N, C, H, W), dtype=jnp.float32)

    blurred = jax.block_until_ready(gaussian_blur(image))

    ref = _reference_blur(np.asarray(image))
    np.testing.assert_allclose(np.asarray(blurred), ref, rtol=1e-5, atol=1e-5)

    print("KERNEL_OK")
</pallas_src>

<mosaic_0001>
module attributes {stable_mosaic.version = 11 : i64} {
  func.func @blur_kernel(%arg0: i32, %arg1: memref<1x16x16xf32, #tpu.memory_space<vmem>>, %arg2: memref<1x16x16xf32, #tpu.memory_space<vmem>>) attributes {dimension_semantics = [#tpu.dimension_semantics<parallel>], iteration_bounds = array<i64: 8>, scalar_prefetch = 0 : i64, scratch_operands = 0 : i64, tpu.core_type = #tpu.core_type<tc>, window_params = [{transform_indices = @transform_0, window_bounds = array<i64: 1, 16, 16>}, {transform_indices = @transform_1, window_bounds = array<i64: 1, 16, 16>}]} {
    %c0 = arith.constant 0 : index
    %c0_0 = arith.constant 0 : index
    %c0_1 = arith.constant 0 : index
    %0 = vector.load %arg1[%c0, %c0_0, %c0_1] : memref<1x16x16xf32, #tpu.memory_space<vmem>>, vector<1x16x16xf32>
    %1 = tpu.iota {dimensions = array<i32: 1>} : vector<1x16x16xi32>
    %2 = tpu.iota {dimensions = array<i32: 2>} : vector<1x16x16xi32>
    %c1_i32 = arith.constant 1 : i32
    %3 = tpu.dynamic_rotate %0 by %c1_i32 dim 1 : vector<1x16x16xf32>, i32 -> vector<1x16x16xf32>
    %c15_i32 = arith.constant 15 : i32
    %4 = tpu.dynamic_rotate %0 by %c15_i32 dim 1 : vector<1x16x16xf32>, i32 -> vector<1x16x16xf32>
    %c0_i32 = arith.constant 0 : i32
    %5 = vector.broadcast %c0_i32 : i32 to vector<1x16x16xi32>
    %6 = arith.cmpi eq, %1, %5 : vector<1x16x16xi32>
    %7 = arith.select %6, %4, %3 : vector<1x16x16xi1>, vector<1x16x16xf32>
    %c15_i32_2 = arith.constant 15 : i32
    %8 = vector.broadcast %c15_i32_2 : i32 to vector<1x16x16xi32>
    %9 = arith.cmpi eq, %1, %8 : vector<1x16x16xi32>
    %10 = arith.select %9, %7, %4 : vector<1x16x16xi1>, vector<1x16x16xf32>
    %cst = arith.constant 0.522011459 : f32
    %11 = vector.broadcast %cst : f32 to vector<1x16x16xf32>
    %12 = arith.mulf %11, %0 : vector<1x16x16xf32>
    %13 = arith.addf %7, %10 : vector<1x16x16xf32>
    %cst_3 = arith.constant 0.238994271 : f32
    %14 = vector.broadcast %cst_3 : f32 to vector<1x16x16xf32>
    %15 = arith.mulf %14, %13 : vector<1x16x16xf32>
    %16 = arith.addf %12, %15 : vector<1x16x16xf32>
    %c1_i32_4 = arith.constant 1 : i32
    %17 = tpu.dynamic_rotate %16 by %c1_i32_4 dim 2 : vector<1x16x16xf32>, i32 -> vector<1x16x16xf32>
    %c15_i32_5 = arith.constant 15 : i32
    %18 = tpu.dynamic_rotate %16 by %c15_i32_5 dim 2 : vector<1x16x16xf32>, i32 -> vector<1x16x16xf32>
    %c0_i32_6 = arith.constant 0 : i32
    %19 = vector.broadcast %c0_i32_6 : i32 to vector<1x16x16xi32>
    %20 = arith.cmpi eq, %2, %19 : vector<1x16x16xi32>
    %21 = arith.select %20, %18, %17 : vector<1x16x16xi1>, vector<1x16x16xf32>
    %c15_i32_7 = arith.constant 15 : i32
    %22 = vector.broadcast %c15_i32_7 : i32 to vector<1x16x16xi32>
    %23 = arith.cmpi eq, %2, %22 : vector<1x16x16xi32>
    %24 = arith.select %23, %21, %18 : vector<1x16x16xi1>, vector<1x16x16xf32>
    %cst_8 = arith.constant 0.522011459 : f32
    %25 = vector.broadcast %cst_8 : f32 to vector<1x16x16xf32>
    %26 = arith.mulf %25, %16 : vector<1x16x16xf32>
    %27 = arith.addf %21, %24 : vector<1x16x16xf32>
    %cst_9 = arith.constant 0.238994271 : f32
    %28 = vector.broadcast %cst_9 : f32 to vector<1x16x16xf32>
    %29 = arith.mulf %28, %27 : vector<1x16x16xf32>
    %30 = arith.addf %26, %29 : vector<1x16x16xf32>
    %c0_10 = arith.constant 0 : index
    %c0_11 = arith.constant 0 : index
    %c0_12 = arith.constant 0 : index
    %31 = vector.load %arg2[%c0_10, %c0_11, %c0_12] : memref<1x16x16xf32, #tpu.memory_space<vmem>>, vector<1x16x16xf32>
    tpu.vector_store %arg2[%c0_10, %c0_11, %c0_12], %30 {strides = array<i32>} : memref<1x16x16xf32, #tpu.memory_space<vmem>>, vector<1x16x16xf32>,
    return
  }
  func.func @transform_0(%arg0: i32) -> (i32, i32, i32) {
    %c0_i32 = arith.constant 0 : i32
    %c0_i32_0 = arith.constant 0 : i32
    %c0_i32_1 = arith.constant 0 : i32
    return %arg0, %c0_i32, %c0_i32_0 : i32, i32, i32
  }
  func.func @transform_1(%arg0: i32) -> (i32, i32, i32) {
    %c0_i32 = arith.constant 0 : i32
    %c0_i32_0 = arith.constant 0 : i32
    %c0_i32_1 = arith.constant 0 : i32
    return %arg0, %c0_i32, %c0_i32_0 : i32, i32, i32
  }
}

</mosaic_0001>

<bundles_post_ra>
// kernel: tpu_custom_call.1
= control target key start
LH: loop header
LB: loop body
LE: loop exit
PB: predicated region body
PF: predicated region fallthrough
CT: control target
= control target key end

     0   :  { %6 = vsyncpa [#allocation3], 0  ;;  %s622_s0 = inlined_call_operand.hbm [shape: f32[8,16,16], index: 0, kind: input, shape index: {}]   ;;  %s623_s1 = inlined_call_operand.hbm [shape: f32[8,16,16], index: 1, kind: output, shape index: {}]  }
   0x1   :  { %8 = vsyncpa [#allocation3 + $0x1], 0 }
   0x2   :  { %9 = vsyncpa [#allocation4], 0 }
   0x3   :  { %11 = vsyncpa [#allocation4 + $0x1], 0  ;;  %s487_s6 = smov 0   ;;  %s489_s7 = smov 0  }
   0x4   :  { %s491_s8 = smov 0   ;;  %s493_s9 = smov 0  }
   0x5 LB: > { %s508_s10 = sadd.s32 4294967295, %s468_s9   ;;  %s303_s11 = sadd.s32 4294967294, %s468_s9   ;;  %s468_s9 = sphi %s493_s9, %s632_s9   ;;  %s464_s8 = sphi %s491_s8, %s631_s8   ;;  %s460_s7 = sphi %s489_s7, %s630_s7   ;;  %s456_s6 = sphi %s487_s6, %s629_s6  }
   0x6   : > { %s512_s12 = sadd.s32 1, %s468_s9   ;;  %s24_s13 = sadd.s32 1, %s464_s8 }
   0x7   : > { %s21_s14 = ssub.s32 %s468_s9, %s512_s12  ;;  %p31_p0 = scmp.ne.s32.totalorder %s464_s8, %s460_s7 }
   0x8   : > { %p22_p1 = scmp.eq.s32.totalorder %s21_s14, 0  ;;  %p32_p2 = scmp.eq.s32.totalorder %s468_s9, 0 }
   0x9   : > { %p37_p3 = scmp.ne.s32.totalorder %s460_s7, %s456_s6  ;;  %p38_p4 = scmp.eq.s32.totalorder %s508_s10, 0 }
   0xa   : > { %s524_s15 = scalar_select %p22_p1, %s464_s8, %s24_s13  }
   0xb   : > { %p526_p5 = por %p32_p2, %p31_p0  ;;  %p530_p6 = por %p38_p4, %p37_p3 }
   0xc   : > { %p61_p7 = scmp.eq.s32.totalorder %s508_s10, 7  ;;  %p67_p8 = scmp.eq.s32.totalorder %s303_s11, 7 }
   0xd   : > { %p331_p9 = scmp.lt.s32.totalorder %s468_s9, 8  ;;  %s87_s20 = sand.u32 1, %s464_s8  }
   0xe   : > { %p536_p10 = por %p61_p7, %p31_p0  ;;  %p540_p11 = por %p67_p8, %p37_p3 }
   0xf   : > { %s317_s21 = sshll.u32 %s468_s9, 4  ;;  %s306_s22 = sshll.u32 %s87_s20, 4 }
  0x10   : > { %s96_s25 = scalar_lea.hbm %s622_s0, %s317_s21  ;;  %s91_s27 = scalar_lea.vmem [#allocation2], %s306_s22 }
  0x11   : > { %s97_s26 = sshll.u32 %s96_s25, 4  ;;  %s99_s28 = sshll.u32 %s91_s27, 4  ;;  %s98_s26 = int_to_ptr.hbm [resolvable:$true] %s97_s26  ;;  %s100_s28 = int_to_ptr.vmem [resolvable:$true] %s99_s28 }
  0x12   : > { %p551_p12 = pnand %p331_p9, %p526_p5  ;;  %p309_p13 = scmp.ge.s32.totalorder %s468_s9, 1 }
  0x13   : > { %p107_p0 = scmp.lt.s32.totalorder %s468_s9, 9  ;;  %s88_s30 = scalar_lea.sflag [#allocation3], %s87_s20 }
  0x14   : > { %s372_s2 = sshra.s32 %s98_s26, 4  ;;  %p376_p2 = pneg %p551_p12  ;;  %s373_s2 = int_to_ptr.hbm [resolvable:$true] %s372_s2 }
  0x15   : > { %s374_s3 = scalar_lea.hbm %s373_s2, 16  ;;  %s379_s11 = scalar_lea.hbm %s622_s0, 128 }
  0x16   : > { %p375_p1 = scmp.ne.s32.totalorder %s373_s2, %s374_s3  ;;  %p380_p5 = scmp.lt.s32.totalorder %s373_s2, %s622_s0 }
  0x17   : > { %p381_p7 = scmp.lt.s32.totalorder %s379_s11, %s374_s3 }
  0x18   : > { %p377_p3 = pnand %p376_p2, %p375_p1 }
  0x19   : > { %p382_p8 = por %p381_p7, %p380_p5 }
  0x1a   : > { %p378_p4 = pneg %p377_p3 }
  0x1c   : > { %p383_p9 = pnand %p382_p8, %p378_p4 }
  0x1e   : > { %386 = shalt.err (!%p383_p9)
}
  0x1f   : > { %s470_s16 = smov 128   ;;  %s471_s20 = smov 8  }
  0x20   : > { %326 = dma.hbm_to_vmem [thread:$0]  (!%p551_p12), %s98_s26, 256, %s100_s28, %s88_s30, %s470_s16, %s470_s16, %s471_s20  }
  0x21   : > { %p108_p1 = pnand %p309_p13, %p107_p0 }
  0x22   : > { %s572_s21 = sand.u32 (!%p108_p1), 1, %s460_s7  }
  0x23   : > { %111 = sbr.rel (%p108_p1) target bundleno = 421 (0x1a5), region = 24  ;;  %s310_s22 = sshll.u32 (!%p108_p1), %s572_s21, 4 }
  0x24   : > { %s114_s23 = scalar_lea.sflag (!%p108_p1), [#allocation3], %s572_s21  ;;  %s117_s24 = scalar_lea.vmem (!%p108_p1), [#allocation2], %s310_s22 }
  0x28   : > { %447 = dma.done.wait (%p530_p6), %s114_s23, 256  }
  0x29   : > { %449 = vsyncadd (%p530_p6), %s114_s23, 4294967040  ;;  %v139_v0 = vlaneseq  ;;  %v137_v3 = vld [vmem:[%s117_s24] sm:$0xff]  ;;  %v138_v4 = vld [vmem:[%s117_s24 + $0x8] sm:$0xff]  ;;  %s472_s17 = smov 16   ;;  %vm170_vm4 = vcmask 1047680   ;;  %s473_s25 = smov 127  }
  0x2a   : > { %v144_v5 = vrot.slane %v137_v3, 7  ;;  %v145_v6 = vrot.slane %v138_v4, 7  ;;  %v149_v7 = vrot.slane %v137_v3, 1  ;;  %v150_v8 = vrot.slane %v138_v4, 1  ;;  %s474_s26 = smov 113   ;;  %s318_s27 = sshll.u32 %s508_s10, 4 }
  0x2b   : > { %v140_v1 = vshrl.u32 %v139_v0, 7  ;;  %v162_v15 = vmul.f32 0.52201146, %v137_v3  ;;  %v163_v20 = vmul.f32 0.52201146, %v138_v4  ;;  %v143_v31 = vand.u32 127, %v139_v0  ;;  %s226_s30 = scalar_lea.hbm %s623_s1, %s318_s27 }
  0x2c   : > { %vm211_vm7 = vcmask 130048   ;;  %s136_s2 = scalar_lea.vmem [#allocation5], %s310_s22  ;;  %s229_s3 = sshll.u32 %s226_s30, 4  ;;  %s230_s3 = int_to_ptr.hbm [resolvable:$true] %s229_s3 }
  0x2d   : > { %v141_v2 = vadd.s32 8, %v140_v1  ;;  %vm146_vm0 = vcmp.lt.s32.totalorder %v140_v1, 1  ;;  %vm151_vm1 = vcmp.lt.s32.totalorder %v140_v1, 7  ;;  %vm154_vm2 = vcmp.eq.s32.totalorder %v140_v1, 0  ;;  %s227_s10 = sshll.u32 %s136_s2, 4  ;;  %s215_s4 = scalar_lea.sflag [#allocation4], %s572_s21  ;;  %s228_s10 = int_to_ptr.vmem [resolvable:$true] %s227_s10 }
  0x2e   : > { %v148_v9 = vsel %vm146_vm0, %v145_v6, %v144_v5  ;;  %v152_v10 = vsel %vm151_vm1, %v149_v7, %v150_v8  ;;  %v147_v11 = vsel %vm146_vm0, %v144_v5, %v145_v6  ;;  %v153_v12 = vsel %vm151_vm1, %v150_v8, %v149_v7  ;;  %s416_s5 = sshra.s32 %s230_s3, 4  ;;  %s422_s16 = scalar_lea.hbm %s623_s1, 128  ;;  %s417_s5 = int_to_ptr.hbm [resolvable:$true] %s416_s5 }
  0x2f   : > { %vm159_vm3 = vcmp.eq.s32.totalorder %v141_v2, 15  ;;  %v156_v13 = vsel %vm154_vm2, %v152_v10, %v148_v9  ;;  %vm183_vm5 = vcmp.eq.s32.totalorder %v143_v31, 0  ;;  %vm200_vm6 = vcmp.eq.s32.totalorder %v143_v31, 15  ;;  %s418_s11 = scalar_lea.hbm %s417_s5, 16  ;;  %p423_p0 = scmp.lt.s32.totalorder %s417_s5, %s623_s1 }
  0x30   : > { %v161_v14 = vsel %vm159_vm3, %v147_v11, %v153_v12  ;;  %v164_v16 = vadd.f32 %v156_v13, %v152_v10  ;;  %p419_p6 = scmp.ne.s32.totalorder %s417_s5, %s418_s11  ;;  %p424_p2 = scmp.lt.s32.totalorder %s422_s16, %s418_s11 }
  0x31   : > { %v165_v18 = vadd.f32 %v161_v14, %v147_v11 }
  0x32   : > { %v166_v17 = vmul.f32 0.23899427, %v164_v16  ;;  %p420_p12 = pnand %p419_p6, %p536_p10  ;;  %p425_p3 = por %p424_p2, %p423_p0 }
  0x33   : > { %v167_v21 = vmul.f32 0.23899427, %v165_v18 }
  0x34   : > { %v168_v19 = vadd.f32 %v166_v17, %v162_v15  ;;  %p421_p13 = pneg %p420_p12 }
  0x35   : > { %v169_v22 = vadd.f32 %v167_v21, %v163_v20 }
  0x36   : > { %171 = vrot.lane.b32.xlu0 %v168_v19, %s472_s17  ;;  %v203_v36 = vmul.f32 0.52201146, %v168_v19  ;;  %p426_p4 = pnand %p425_p3, %p421_p13 }
  0x37   : > { %v204_v44 = vmul.f32 0.52201146, %v169_v22 }
  0x3e   : > { %174 = vrot.lane.b32.xlu0 %v169_v22, %s472_s17 }
  0xa8   : > { %v172_v23 = vpop.permute.xlu0 %171 }
  0xa9   : > { %v173_v24 = vsel %vm170_vm4, %v172_v23, %v168_v19 }
  0xaa   : > { %177 = vrot.lane.b32.xlu1 %v173_v24, %s472_s17 }
  0xb0   : > { %v175_v25 = vpop.permute.xlu0 %174 }
  0xb1   : > { %v176_v26 = vsel %vm170_vm4, %v175_v25, %v169_v22 }
  0xb2   : > { %179 = vrot.lane.b32.xlu1 %v176_v26, %s472_s17 }
 0x11c   : > { %v178_v27 = vpop.permute.xlu1 %177 }
 0x11d   : > { %v181_v28 = vsel %vm170_vm4, %v178_v27, %v168_v19 }
 0x11e   : > { %186 = vrot.lane.b32.xlu2 %v181_v28, %s473_s25  ;;  %192 = vrot.lane.b32.xlu0 %v181_v28, %s474_s26 }
 0x124   : > { %v180_v29 = vpop.permute.xlu1 %179 }
 0x125   : > { %v182_v30 = vsel %vm170_vm4, %v180_v29, %v169_v22 }
 0x126   : > { %194 = vrot.lane.b32.xlu1 %v182_v30, %s474_s26  ;;  %188 = vrot.lane.b32.xlu2 %v182_v30, %s473_s25 }
 0x178   : > { %v187_v32 = vpop.permute.xlu2 %186 }
 0x180   : > { %v189_v40 = vpop.permute.xlu2 %188 }
 0x190   : > { %v193_v33 = vpop.permute.xlu0 %192 }
 0x191   : > { %v198_v34 = vsel %vm183_vm5, %v187_v32, %v193_v33 }
 0x192   : > { %v201_v35 = vsel %vm200_vm6, %v198_v34, %v187_v32 }
 0x193   : > { %v205_v37 = vadd.f32 %v201_v35, %v198_v34 }
 0x195   : > { %v207_v38 = vmul.f32 0.23899427, %v205_v37 }
 0x197   : > { %v209_v39 = vadd.f32 %v207_v38, %v203_v36 }
 0x198   : > { %v195_v41 = vpop.permute.xlu1 %194 }
 0x199   : > { %212 = vst.msk [vmem:[%s136_s2] sm:$0xff] %vm211_vm7, %v209_v39  ;;  %v199_v42 = vsel %vm183_vm5, %v189_v40, %v195_v41 }
 0x19a   : > { %v202_v43 = vsel %vm200_vm6, %v199_v42, %v189_v40 }
 0x19b   : > { %v206_v45 = vadd.f32 %v202_v43, %v199_v42 }
 0x19d   : > { %v208_v46 = vmul.f32 0.23899427, %v206_v45 }
 0x19f   : > { %v210_v47 = vadd.f32 %v208_v46, %v204_v44 }
 0x1a1   : > { %213 = vst.msk [vmem:[%s136_s2 + $0x8] sm:$0xff] %vm211_vm7, %v210_v47 }
 0x1a2   : > { %429 = shalt.err (!%p426_p4)
}
 0x1a3   : > { %s475_s21 = smov 128   ;;  %s476_s23 = smov 8  }
 0x1a4   : > { %321 = dma.vmem_to_hbm [thread:$0]  (%p536_p10), %s228_s10, 256, %s230_s3, %s215_s4, %s475_s21, %s475_s21, %s476_s23  }
 0x1a5 PF: > { %p332_p5 = scmp.ge.s32.totalorder %s468_s9, 2  ;;  %s244_s24 = sand.u32 1, %s456_s6  }
 0x1a6   : > { %s245_s17 = scalar_lea.sflag [#allocation4], %s244_s24 }
 0x1a7   : > { %p328_p7 = pnand %p332_p5, %p540_p11 }
 0x1a9   : > { %p329_p8 = pneg %p328_p7 }
 0x1ab   : > { %451 = dma.done.wait (%p329_p8), %s245_s17, 256  }
 0x1ac   : > { %453 = vsyncadd (%p329_p8), %s245_s17, 4294967040  ;;  %p14_p9 = scmp.ge.s32.totalorder %s512_s12, 10   ;;  %s629_s6 = smov %s460_s7 }
 0x1ad   : > { %s630_s7 = smov %s464_s8  ;;  %s631_s8 = smov %s524_s15 }
 0x1ae   : > { %s632_s9 = smov %s512_s12  ;;  %16 = sbr.rel (!%p14_p9) target bundleno = 5 (0x5), region = 69 }
 0x1b3   :  { %251 = vsyncpa [#allocation3], 1 }
 0x1b4   :  { %253 = vsyncpa [#allocation3 + $0x1], 1 }
 0x1b5   :  { %254 = vsyncpa [#allocation4], 1 }
 0x1b6   :  { %256 = vsyncpa [#allocation4 + $0x1], 1 }

</bundles_post_ra>
